<compile_context>
chip_gen: v6e
topology: v6e:2x2x1
jax: 0.10.0
libtpu: 0.0.40
codegen_flags: <defaults>
</compile_context>

<pallas_src>
import jax
import jax.numpy as jnp
from jax import lax
from jax.experimental import pallas as pl
from jax.experimental.pallas import tpu as pltpu

_LANE = 128                       # lanes per spatial row
_TARGET_BLOCK_BYTES = 2 << 20     # ~2 MiB per input slab per grid step
_MIN_GRID_STEPS = 4               # keep both v7x TensorCores + pipeline busy


def _sub_rows(c):
    """Sublane rows per inner compute chunk, tuned to vreg pressure."""
    if c <= 4:
        return 32
    if c <= 6:
        return 16
    return 8


def _bilinear_nchw_kernel(w_ref, b_ref, x1_ref, x2_ref, o_ref):
    """out[o, r, q] = sum_{i,j} W[o,i,j] * x1[i,r,q] * x2[j,r,q] + b[o].

    x1_ref, x2_ref, o_ref: (C, TR, 128) VMEM tiles (spatial on sublane/lane).
    w_ref: (C*C*C,) f32 in SMEM (scalar reads).  b_ref: (C,) f32 in SMEM.
    """
    c, tr, _ = o_ref.shape

    # Hoist all C^3 weight scalars and C bias scalars out of the row loop:
    # one SMEM read each per grid step instead of per row-chunk, so scalar
    # loads/broadcasts cannot co-issue-limit the VALU-bound inner loop.
    wv = [w_ref[k] for k in range(c * c * c)]
    bv = [b_ref[o] for o in range(c)]

    def compute_rows(r0, nrows):
        rows = pl.ds(r0, nrows)
        x1 = [x1_ref[i, rows, :].astype(jnp.float32) for i in range(c)]
        x2 = [x2_ref[j, rows, :].astype(jnp.float32) for j in range(c)]
        for o in range(c):
            acc = None
            for i in range(c):
                t = None
                for j in range(c):
                    term = wv[(o * c + i) * c + j] * x2[j]
                    t = term if t is None else t + term
                contrib = x1[i] * t
                acc = contrib if acc is None else acc + contrib
            acc = acc + bv[o]
            o_ref[o, rows, :] = acc.astype(o_ref.dtype)

    sub = min(tr, _sub_rows(c))
    n_full = tr // sub
    rem = tr - n_full * sub

    def body(s, carry):
        compute_rows(pl.multiple_of(s * sub, sub), sub)
        return carry

    if n_full > 0:
        # Unroll so the LLO scheduler can interleave vld/vst with the long
        # VALU chains; keep it modest for large C to bound code size.
        unroll = (True if n_full <= 16 else 4) if c <= 4 else 2
        lax.fori_loop(0, n_full, body, 0, unroll=unroll)
    if rem > 0:
        compute_rows(n_full * sub, rem)


def _choose_row_tile(total_rows, channels, batch, itemsize):
    """Rows (of 128 lanes) per grid step.

    ~_TARGET_BLOCK_BYTES per input slab, a multiple of 8 (or the full extent),
    then halved (floor 8) until batch * row_tiles >= _MIN_GRID_STEPS.  The row
    grid uses cdiv, so a partial final tile is fine (no padding)."""
    bytes_per_row = channels * _LANE * itemsize
    max_rows = max(8, (_TARGET_BLOCK_BYTES // bytes_per_row) // 8 * 8)
    tr = total_rows if total_rows <= max_rows else max_rows
    while tr > 8 and batch * pl.cdiv(total_rows, tr) < _MIN_GRID_STEPS:
        new_tr = max(8, ((tr // 2) + 7) // 8 * 8)
        if new_tr >= tr:
            break
        tr = new_tr
    return tr


def billinear_fusion(x1, x2, weight, bias):
    """nn.Bilinear(C, C, C) applied per spatial position of NCHW inputs.

    x1, x2: (N, C, H, W); weight: (C, C, C) with W[o, i, j]; bias: (C,).
    Returns (N, C, H, W) in x1.dtype.
    """
    n, c, h, w = x1.shape
    assert x2.shape == x1.shape
    assert x2.dtype == x1.dtype
    assert weight.shape == (c, c, c) and bias.shape == (c,)
    if c > 8:
        # TODO(synk): large in_channels needs a matmul-based kernel tiled over
        # the output-channel axis (W streamed through VMEM, not SMEM); this
        # SMEM/VPU formulation targets the small-C case this module is used with.
        raise NotImplementedError(
            "billinear_fusion Pallas kernel supports in_channels <= 8")

    l = h * w
    total_rows = pl.cdiv(l, _LANE)
    lp = total_rows * _LANE

    # NCHW -> (N, C, L) is a free reshape (no transpose, no extra HBM pass).
    # Keep the HBM-side dtype narrow; upcast to f32 in-register inside the kernel.
    x1f = x1.reshape(n, c, l)
    x2f = x2.reshape(n, c, l)
    if lp != l:
        # TODO(synk): ragged spatial tail (< one 128-lane row) still uses a
        # wrapper pad + output slice; masking it in-kernel would need a flat-L
        # layout.  Not hit when H*W is a multiple of 128.
        pad = ((0, 0), (0, 0), (0, lp - l))
        x1f = jnp.pad(x1f, pad)
        x2f = jnp.pad(x2f, pad)
    x1f = x1f.reshape(n, c, total_rows, _LANE)
    x2f = x2f.reshape(n, c, total_rows, _LANE)

    itemsize = jnp.dtype(x1.dtype).itemsize
    tr = _choose_row_tile(total_rows, c, n, itemsize)
    grid = (n, pl.cdiv(total_rows, tr))

    w_flat = weight.astype(jnp.float32).reshape(c * c * c)
    b_flat = bias.astype(jnp.float32).reshape(c)

    # Scoped VMEM: (2 input slabs + 1 output slab) double-buffered, plus headroom.
    slab = c * tr * _LANE * itemsize
    vmem_limit = int(min(max(2 * 3 * slab + (8 << 20), 32 << 20), 64 << 20))

    def tile_spec():
        return pl.BlockSpec((None, c, tr, _LANE), lambda nb, rb: (nb, 0, rb, 0))

    out = pl.pallas_call(
        _bilinear_nchw_kernel,
        out_shape=jax.ShapeDtypeStruct((n, c, total_rows, _LANE), x1.dtype),
        grid_spec=pltpu.PrefetchScalarGridSpec(
            num_scalar_prefetch=0,
            grid=grid,
            in_specs=[
                pl.BlockSpec(memory_space=pltpu.MemorySpace.SMEM),  # W (flattened)
                pl.BlockSpec(memory_space=pltpu.MemorySpace.SMEM),  # bias
                tile_spec(),                                        # x1 tile
                tile_spec(),                                        # x2 tile
            ],
            out_specs=tile_spec(),
        ),
        compiler_params=pltpu.CompilerParams(
            dimension_semantics=("parallel", "parallel"),
            vmem_limit_bytes=vmem_limit),
    )(w_flat, b_flat, x1f, x2f)

    out = out.reshape(n, c, lp)
    if lp != l:
        out = out[:, :, :l]
    return out.reshape(n, c, h, w)


def reference(x1, x2, weight, bias):
    x1n = jnp.transpose(x1, (0, 2, 3, 1))
    x2n = jnp.transpose(x2, (0, 2, 3, 1))
    out = jnp.einsum("nhwi,oij,nhwj->nhwo", x1n, weight, x2n) + bias
    return jnp.transpose(out, (0, 3, 1, 2))


if __name__ == "__main__":
    key = jax.random.PRNGKey(0)
    k1, k2, kw, kb = jax.random.split(key, 4)

    N, C, H, W = 2, 4, 16, 16
    x1 = jax.random.normal(k1, (N, C, H, W), dtype=jnp.float32)
    x2 = jax.random.normal(k2, (N, C, H, W), dtype=jnp.float32)

    # nn.Bilinear init: U(-1/sqrt(in1_features), 1/sqrt(in1_features))
    bound = 1.0 / jnp.sqrt(jnp.float32(C))
    weight = jax.random.uniform(kw, (C, C, C), jnp.float32, -bound, bound)
    bias = jax.random.uniform(kb, (C,), jnp.float32, -bound, bound)

    out = billinear_fusion(x1, x2, weight, bias)
    out = jax.block_until_ready(out)

    ref = reference(x1, x2, weight, bias)
    assert out.shape == (N, C, H, W)
    assert jnp.allclose(out, ref, atol=1e-5, rtol=1e-5), "mismatch vs reference"

    print("KERNEL_OK")
</pallas_src>

<mosaic_0001>
module attributes {stable_mosaic.version = 11 : i64} {
  func.func @_bilinear_nchw_kernel(%arg0: i32, %arg1: i32, %arg2: memref<64xf32, #tpu.memory_space<smem>>, %arg3: memref<4xf32, #tpu.memory_space<smem>>, %arg4: memref<1x4x2x128xf32, #tpu.memory_space<vmem>>, %arg5: memref<1x4x2x128xf32, #tpu.memory_space<vmem>>, %arg6: memref<1x4x2x128xf32, #tpu.memory_space<vmem>>) attributes {dimension_semantics = [#tpu.dimension_semantics<parallel>, #tpu.dimension_semantics<parallel>], iteration_bounds = array<i64: 2, 1>, scalar_prefetch = 0 : i64, scratch_operands = 0 : i64, tpu.core_type = #tpu.core_type<tc>, window_params = [{transform_indices = @transform_0, window_bounds = array<i64: 64>}, {transform_indices = @transform_1, window_bounds = array<i64: 4>}, {transform_indices = @transform_2, window_bounds = array<i64: 1, 4, 2, 128>}, {transform_indices = @transform_3, window_bounds = array<i64: 1, 4, 2, 128>}, {transform_indices = @transform_4, window_bounds = array<i64: 1, 4, 2, 128>}]} {
    %c0 = arith.constant 0 : index
    %0 = memref.load %arg2[%c0] : memref<64xf32, #tpu.memory_space<smem>>
    %c1 = arith.constant 1 : index
    %1 = memref.load %arg2[%c1] : memref<64xf32, #tpu.memory_space<smem>>
    %c2 = arith.constant 2 : index
    %2 = memref.load %arg2[%c2] : memref<64xf32, #tpu.memory_space<smem>>
    %c3 = arith.constant 3 : index
    %3 = memref.load %arg2[%c3] : memref<64xf32, #tpu.memory_space<smem>>
    %c4 = arith.constant 4 : index
    %4 = memref.load %arg2[%c4] : memref<64xf32, #tpu.memory_space<smem>>
    %c5 = arith.constant 5 : index
    %5 = memref.load %arg2[%c5] : memref<64xf32, #tpu.memory_space<smem>>
    %c6 = arith.constant 6 : index
    %6 = memref.load %arg2[%c6] : memref<64xf32, #tpu.memory_space<smem>>
    %c7 = arith.constant 7 : index
    %7 = memref.load %arg2[%c7] : memref<64xf32, #tpu.memory_space<smem>>
    %c8 = arith.constant 8 : index
    %8 = memref.load %arg2[%c8] : memref<64xf32, #tpu.memory_space<smem>>
    %c9 = arith.constant 9 : index
    %9 = memref.load %arg2[%c9] : memref<64xf32, #tpu.memory_space<smem>>
    %c10 = arith.constant 10 : index
    %10 = memref.load %arg2[%c10] : memref<64xf32, #tpu.memory_space<smem>>
    %c11 = arith.constant 11 : index
    %11 = memref.load %arg2[%c11] : memref<64xf32, #tpu.memory_space<smem>>
    %c12 = arith.constant 12 : index
    %12 = memref.load %arg2[%c12] : memref<64xf32, #tpu.memory_space<smem>>
    %c13 = arith.constant 13 : index
    %13 = memref.load %arg2[%c13] : memref<64xf32, #tpu.memory_space<smem>>
    %c14 = arith.constant 14 : index
    %14 = memref.load %arg2[%c14] : memref<64xf32, #tpu.memory_space<smem>>
    %c15 = arith.constant 15 : index
    %15 = memref.load %arg2[%c15] : memref<64xf32, #tpu.memory_space<smem>>
    %c16 = arith.constant 16 : index
    %16 = memref.load %arg2[%c16] : memref<64xf32, #tpu.memory_space<smem>>
    %c17 = arith.constant 17 : index
    %17 = memref.load %arg2[%c17] : memref<64xf32, #tpu.memory_space<smem>>
    %c18 = arith.constant 18 : index
    %18 = memref.load %arg2[%c18] : memref<64xf32, #tpu.memory_space<smem>>
    %c19 = arith.constant 19 : index
    %19 = memref.load %arg2[%c19] : memref<64xf32, #tpu.memory_space<smem>>
    %c20 = arith.constant 20 : index
    %20 = memref.load %arg2[%c20] : memref<64xf32, #tpu.memory_space<smem>>
    %c21 = arith.constant 21 : index
    %21 = memref.load %arg2[%c21] : memref<64xf32, #tpu.memory_space<smem>>
    %c22 = arith.constant 22 : index
    %22 = memref.load %arg2[%c22] : memref<64xf32, #tpu.memory_space<smem>>
    %c23 = arith.constant 23 : index
    %23 = memref.load %arg2[%c23] : memref<64xf32, #tpu.memory_space<smem>>
    %c24 = arith.constant 24 : index
    %24 = memref.load %arg2[%c24] : memref<64xf32, #tpu.memory_space<smem>>
    %c25 = arith.constant 25 : index
    %25 = memref.load %arg2[%c25] : memref<64xf32, #tpu.memory_space<smem>>
    %c26 = arith.constant 26 : index
    %26 = memref.load %arg2[%c26] : memref<64xf32, #tpu.memory_space<smem>>
    %c27 = arith.constant 27 : index
    %27 = memref.load %arg2[%c27] : memref<64xf32, #tpu.memory_space<smem>>
    %c28 = arith.constant 28 : index
    %28 = memref.load %arg2[%c28] : memref<64xf32, #tpu.memory_space<smem>>
    %c29 = arith.constant 29 : index
    %29 = memref.load %arg2[%c29] : memref<64xf32, #tpu.memory_space<smem>>
    %c30 = arith.constant 30 : index
    %30 = memref.load %arg2[%c30] : memref<64xf32, #tpu.memory_space<smem>>
    %c31 = arith.constant 31 : index
    %31 = memref.load %arg2[%c31] : memref<64xf32, #tpu.memory_space<smem>>
    %c32 = arith.constant 32 : index
    %32 = memref.load %arg2[%c32] : memref<64xf32, #tpu.memory_space<smem>>
    %c33 = arith.constant 33 : index
    %33 = memref.load %arg2[%c33] : memref<64xf32, #tpu.memory_space<smem>>
    %c34 = arith.constant 34 : index
    %34 = memref.load %arg2[%c34] : memref<64xf32, #tpu.memory_space<smem>>
    %c35 = arith.constant 35 : index
    %35 = memref.load %arg2[%c35] : memref<64xf32, #tpu.memory_space<smem>>
    %c36 = arith.constant 36 : index
    %36 = memref.load %arg2[%c36] : memref<64xf32, #tpu.memory_space<smem>>
    %c37 = arith.constant 37 : index
    %37 = memref.load %arg2[%c37] : memref<64xf32, #tpu.memory_space<smem>>
    %c38 = arith.constant 38 : index
    %38 = memref.load %arg2[%c38] : memref<64xf32, #tpu.memory_space<smem>>
    %c39 = arith.constant 39 : index
    %39 = memref.load %arg2[%c39] : memref<64xf32, #tpu.memory_space<smem>>
    %c40 = arith.constant 40 : index
    %40 = memref.load %arg2[%c40] : memref<64xf32, #tpu.memory_space<smem>>
    %c41 = arith.constant 41 : index
    %41 = memref.load %arg2[%c41] : memref<64xf32, #tpu.memory_space<smem>>
    %c42 = arith.constant 42 : index
    %42 = memref.load %arg2[%c42] : memref<64xf32, #tpu.memory_space<smem>>
    %c43 = arith.constant 43 : index
    %43 = memref.load %arg2[%c43] : memref<64xf32, #tpu.memory_space<smem>>
    %c44 = arith.constant 44 : index
    %44 = memref.load %arg2[%c44] : memref<64xf32, #tpu.memory_space<smem>>
    %c45 = arith.constant 45 : index
    %45 = memref.load %arg2[%c45] : memref<64xf32, #tpu.memory_space<smem>>
    %c46 = arith.constant 46 : index
    %46 = memref.load %arg2[%c46] : memref<64xf32, #tpu.memory_space<smem>>
    %c47 = arith.constant 47 : index
    %47 = memref.load %arg2[%c47] : memref<64xf32, #tpu.memory_space<smem>>
    %c48 = arith.constant 48 : index
    %48 = memref.load %arg2[%c48] : memref<64xf32, #tpu.memory_space<smem>>
    %c49 = arith.constant 49 : index
    %49 = memref.load %arg2[%c49] : memref<64xf32, #tpu.memory_space<smem>>
    %c50 = arith.constant 50 : index
    %50 = memref.load %arg2[%c50] : memref<64xf32, #tpu.memory_space<smem>>
    %c51 = arith.constant 51 : index
    %51 = memref.load %arg2[%c51] : memref<64xf32, #tpu.memory_space<smem>>
    %c52 = arith.constant 52 : index
    %52 = memref.load %arg2[%c52] : memref<64xf32, #tpu.memory_space<smem>>
    %c53 = arith.constant 53 : index
    %53 = memref.load %arg2[%c53] : memref<64xf32, #tpu.memory_space<smem>>
    %c54 = arith.constant 54 : index
    %54 = memref.load %arg2[%c54] : memref<64xf32, #tpu.memory_space<smem>>
    %c55 = arith.constant 55 : index
    %55 = memref.load %arg2[%c55] : memref<64xf32, #tpu.memory_space<smem>>
    %c56 = arith.constant 56 : index
    %56 = memref.load %arg2[%c56] : memref<64xf32, #tpu.memory_space<smem>>
    %c57 = arith.constant 57 : index
    %57 = memref.load %arg2[%c57] : memref<64xf32, #tpu.memory_space<smem>>
    %c58 = arith.constant 58 : index
    %58 = memref.load %arg2[%c58] : memref<64xf32, #tpu.memory_space<smem>>
    %c59 = arith.constant 59 : index
    %59 = memref.load %arg2[%c59] : memref<64xf32, #tpu.memory_space<smem>>
    %c60 = arith.constant 60 : index
    %60 = memref.load %arg2[%c60] : memref<64xf32, #tpu.memory_space<smem>>
    %c61 = arith.constant 61 : index
    %61 = memref.load %arg2[%c61] : memref<64xf32, #tpu.memory_space<smem>>
    %c62 = arith.constant 62 : index
    %62 = memref.load %arg2[%c62] : memref<64xf32, #tpu.memory_space<smem>>
    %c63 = arith.constant 63 : index
    %63 = memref.load %arg2[%c63] : memref<64xf32, #tpu.memory_space<smem>>
    %c0_0 = arith.constant 0 : index
    %64 = memref.load %arg3[%c0_0] : memref<4xf32, #tpu.memory_space<smem>>
    %c1_1 = arith.constant 1 : index
    %65 = memref.load %arg3[%c1_1] : memref<4xf32, #tpu.memory_space<smem>>
    %c2_2 = arith.constant 2 : index
    %66 = memref.load %arg3[%c2_2] : memref<4xf32, #tpu.memory_space<smem>>
    %c3_3 = arith.constant 3 : index
    %67 = memref.load %arg3[%c3_3] : memref<4xf32, #tpu.memory_space<smem>>
    %c0_i32 = arith.constant 0 : i32
    %c2_i32 = arith.constant 2 : i32
    %68 = arith.muli %c0_i32, %c2_i32 : i32
    %69 = tpu.assume_multiple %68, 2 : i32
    %c0_4 = arith.constant 0 : index
    %c0_5 = arith.constant 0 : index
    %70 = arith.index_cast %69 : i32 to index
    %c0_6 = arith.constant 0 : index
    %71 = vector.load %arg4[%c0_4, %c0_5, %70, %c0_6] : memref<1x4x2x128xf32, #tpu.memory_space<vmem>>, vector<1x1x2x128xf32>
    %72 = vector.shape_cast %71 : vector<1x1x2x128xf32> to vector<2x128xf32>
    %c0_7 = arith.constant 0 : index
    %c1_8 = arith.constant 1 : index
    %73 = arith.index_cast %69 : i32 to index
    %c0_9 = arith.constant 0 : index
    %74 = vector.load %arg4[%c0_7, %c1_8, %73, %c0_9] : memref<1x4x2x128xf32, #tpu.memory_space<vmem>>, vector<1x1x2x128xf32>
    %75 = vector.shape_cast %74 : vector<1x1x2x128xf32> to vector<2x128xf32>
    %c0_10 = arith.constant 0 : index
    %c2_11 = arith.constant 2 : index
    %76 = arith.index_cast %69 : i32 to index
    %c0_12 = arith.constant 0 : index
    %77 = vector.load %arg4[%c0_10, %c2_11, %76, %c0_12] : memref<1x4x2x128xf32, #tpu.memory_space<vmem>>, vector<1x1x2x128xf32>
    %78 = vector.shape_cast %77 : vector<1x1x2x128xf32> to vector<2x128xf32>
    %c0_13 = arith.constant 0 : index
    %c3_14 = arith.constant 3 : index
    %79 = arith.index_cast %69 : i32 to index
    %c0_15 = arith.constant 0 : index
    %80 = vector.load %arg4[%c0_13, %c3_14, %79, %c0_15] : memref<1x4x2x128xf32, #tpu.memory_space<vmem>>, vector<1x1x2x128xf32>
    %81 = vector.shape_cast %80 : vector<1x1x2x128xf32> to vector<2x128xf32>
    %c0_16 = arith.constant 0 : index
    %c0_17 = arith.constant 0 : index
    %82 = arith.index_cast %69 : i32 to index
    %c0_18 = arith.constant 0 : index
    %83 = vector.load %arg5[%c0_16, %c0_17, %82, %c0_18] : memref<1x4x2x128xf32, #tpu.memory_space<vmem>>, vector<1x1x2x128xf32>
    %84 = vector.shape_cast %83 : vector<1x1x2x128xf32> to vector<2x128xf32>
    %c0_19 = arith.constant 0 : index
    %c1_20 = arith.constant 1 : index
    %85 = arith.index_cast %69 : i32 to index
    %c0_21 = arith.constant 0 : index
    %86 = vector.load %arg5[%c0_19, %c1_20, %85, %c0_21] : memref<1x4x2x128xf32, #tpu.memory_space<vmem>>, vector<1x1x2x128xf32>
    %87 = vector.shape_cast %86 : vector<1x1x2x128xf32> to vector<2x128xf32>
    %c0_22 = arith.constant 0 : index
    %c2_23 = arith.constant 2 : index
    %88 = arith.index_cast %69 : i32 to index
    %c0_24 = arith.constant 0 : index
    %89 = vector.load %arg5[%c0_22, %c2_23, %88, %c0_24] : memref<1x4x2x128xf32, #tpu.memory_space<vmem>>, vector<1x1x2x128xf32>
    %90 = vector.shape_cast %89 : vector<1x1x2x128xf32> to vector<2x128xf32>
    %c0_25 = arith.constant 0 : index
    %c3_26 = arith.constant 3 : index
    %91 = arith.index_cast %69 : i32 to index
    %c0_27 = arith.constant 0 : index
    %92 = vector.load %arg5[%c0_25, %c3_26, %91, %c0_27] : memref<1x4x2x128xf32, #tpu.memory_space<vmem>>, vector<1x1x2x128xf32>
    %93 = vector.shape_cast %92 : vector<1x1x2x128xf32> to vector<2x128xf32>
    %94 = vector.broadcast %0 : f32 to vector<2x128xf32>
    %95 = arith.mulf %94, %84 : vector<2x128xf32>
    %96 = vector.broadcast %1 : f32 to vector<2x128xf32>
    %97 = arith.mulf %96, %87 : vector<2x128xf32>
    %98 = arith.addf %95, %97 : vector<2x128xf32>
    %99 = vector.broadcast %2 : f32 to vector<2x128xf32>
    %100 = arith.mulf %99, %90 : vector<2x128xf32>
    %101 = arith.addf %98, %100 : vector<2x128xf32>
    %102 = vector.broadcast %3 : f32 to vector<2x128xf32>
    %103 = arith.mulf %102, %93 : vector<2x128xf32>
    %104 = arith.addf %101, %103 : vector<2x128xf32>
    %105 = arith.mulf %72, %104 : vector<2x128xf32>
    %106 = vector.broadcast %4 : f32 to vector<2x128xf32>
    %107 = arith.mulf %106, %84 : vector<2x128xf32>
    %108 = vector.broadcast %5 : f32 to vector<2x128xf32>
    %109 = arith.mulf %108, %87 : vector<2x128xf32>
    %110 = arith.addf %107, %109 : vector<2x128xf32>
    %111 = vector.broadcast %6 : f32 to vector<2x128xf32>
    %112 = arith.mulf %111, %90 : vector<2x128xf32>
    %113 = arith.addf %110, %112 : vector<2x128xf32>
    %114 = vector.broadcast %7 : f32 to vector<2x128xf32>
    %115 = arith.mulf %114, %93 : vector<2x128xf32>
    %116 = arith.addf %113, %115 : vector<2x128xf32>
    %117 = arith.mulf %75, %116 : vector<2x128xf32>
    %118 = arith.addf %105, %117 : vector<2x128xf32>
    %119 = vector.broadcast %8 : f32 to vector<2x128xf32>
    %120 = arith.mulf %119, %84 : vector<2x128xf32>
    %121 = vector.broadcast %9 : f32 to vector<2x128xf32>
    %122 = arith.mulf %121, %87 : vector<2x128xf32>
    %123 = arith.addf %120, %122 : vector<2x128xf32>
    %124 = vector.broadcast %10 : f32 to vector<2x128xf32>
    %125 = arith.mulf %124, %90 : vector<2x128xf32>
    %126 = arith.addf %123, %125 : vector<2x128xf32>
    %127 = vector.broadcast %11 : f32 to vector<2x128xf32>
    %128 = arith.mulf %127, %93 : vector<2x128xf32>
    %129 = arith.addf %126, %128 : vector<2x128xf32>
    %130 = arith.mulf %78, %129 : vector<2x128xf32>
    %131 = arith.addf %118, %130 : vector<2x128xf32>
    %132 = vector.broadcast %12 : f32 to vector<2x128xf32>
    %133 = arith.mulf %132, %84 : vector<2x128xf32>
    %134 = vector.broadcast %13 : f32 to vector<2x128xf32>
    %135 = arith.mulf %134, %87 : vector<2x128xf32>
    %136 = arith.addf %133, %135 : vector<2x128xf32>
    %137 = vector.broadcast %14 : f32 to vector<2x128xf32>
    %138 = arith.mulf %137, %90 : vector<2x128xf32>
    %139 = arith.addf %136, %138 : vector<2x128xf32>
    %140 = vector.broadcast %15 : f32 to vector<2x128xf32>
    %141 = arith.mulf %140, %93 : vector<2x128xf32>
    %142 = arith.addf %139, %141 : vector<2x128xf32>
    %143 = arith.mulf %81, %142 : vector<2x128xf32>
    %144 = arith.addf %131, %143 : vector<2x128xf32>
    %145 = vector.broadcast %64 : f32 to vector<2x128xf32>
    %146 = arith.addf %144, %145 : vector<2x128xf32>
    %c0_28 = arith.constant 0 : index
    %c0_29 = arith.constant 0 : index
    %147 = arith.index_cast %69 : i32 to index
    %c0_30 = arith.constant 0 : index
    %148 = vector.load %arg6[%c0_28, %c0_29, %147, %c0_30] : memref<1x4x2x128xf32, #tpu.memory_space<vmem>>, vector<1x1x2x128xf32>
    %149 = vector.shape_cast %148 : vector<1x1x2x128xf32> to vector<2x128xf32>
    %150 = vector.shape_cast %146 : vector<2x128xf32> to vector<1x1x2x128xf32>
    tpu.vector_store %arg6[%c0_28, %c0_29, %147, %c0_30], %150 {strides = array<i32>} : memref<1x4x2x128xf32, #tpu.memory_space<vmem>>, vector<1x1x2x128xf32>,
    %151 = vector.broadcast %16 : f32 to vector<2x128xf32>
    %152 = arith.mulf %151, %84 : vector<2x128xf32>
    %153 = vector.broadcast %17 : f32 to vector<2x128xf32>
    %154 = arith.mulf %153, %87 : vector<2x128xf32>
    %155 = arith.addf %152, %154 : vector<2x128xf32>
    %156 = vector.broadcast %18 : f32 to vector<2x128xf32>
    %157 = arith.mulf %156, %90 : vector<2x128xf32>
    %158 = arith.addf %155, %157 : vector<2x128xf32>
    %159 = vector.broadcast %19 : f32 to vector<2x128xf32>
    %160 = arith.mulf %159, %93 : vector<2x128xf32>
    %161 = arith.addf %158, %160 : vector<2x128xf32>
    %162 = arith.mulf %72, %161 : vector<2x128xf32>
    %163 = vector.broadcast %20 : f32 to vector<2x128xf32>
    %164 = arith.mulf %163, %84 : vector<2x128xf32>
    %165 = vector.broadcast %21 : f32 to vector<2x128xf32>
    %166 = arith.mulf %165, %87 : vector<2x128xf32>
    %167 = arith.addf %164, %166 : vector<2x128xf32>
    %168 = vector.broadcast %22 : f32 to vector<2x128xf32>
    %169 = arith.mulf %168, %90 : vector<2x128xf32>
    %170 = arith.addf %167, %169 : vector<2x128xf32>
    %171 = vector.broadcast %23 : f32 to vector<2x128xf32>
    %172 = arith.mulf %171, %93 : vector<2x128xf32>
    %173 = arith.addf %170, %172 : vector<2x128xf32>
    %174 = arith.mulf %75, %173 : vector<2x128xf32>
    %175 = arith.addf %162, %174 : vector<2x128xf32>
    %176 = vector.broadcast %24 : f32 to vector<2x128xf32>
    %177 = arith.mulf %176, %84 : vector<2x128xf32>
    %178 = vector.broadcast %25 : f32 to vector<2x128xf32>
    %179 = arith.mulf %178, %87 : vector<2x128xf32>
    %180 = arith.addf %177, %179 : vector<2x128xf32>
    %181 = vector.broadcast %26 : f32 to vector<2x128xf32>
    %182 = arith.mulf %181, %90 : vector<2x128xf32>
    %183 = arith.addf %180, %182 : vector<2x128xf32>
    %184 = vector.broadcast %27 : f32 to vector<2x128xf32>
    %185 = arith.mulf %184, %93 : vector<2x128xf32>
    %186 = arith.addf %183, %185 : vector<2x128xf32>
    %187 = arith.mulf %78, %186 : vector<2x128xf32>
    %188 = arith.addf %175, %187 : vector<2x128xf32>
    %189 = vector.broadcast %28 : f32 to vector<2x128xf32>
    %190 = arith.mulf %189, %84 : vector<2x128xf32>
    %191 = vector.broadcast %29 : f32 to vector<2x128xf32>
    %192 = arith.mulf %191, %87 : vector<2x128xf32>
    %193 = arith.addf %190, %192 : vector<2x128xf32>
    %194 = vector.broadcast %30 : f32 to vector<2x128xf32>
    %195 = arith.mulf %194, %90 : vector<2x128xf32>
    %196 = arith.addf %193, %195 : vector<2x128xf32>
    %197 = vector.broadcast %31 : f32 to vector<2x128xf32>
    %198 = arith.mulf %197, %93 : vector<2x128xf32>
    %199 = arith.addf %196, %198 : vector<2x128xf32>
    %200 = arith.mulf %81, %199 : vector<2x128xf32>
    %201 = arith.addf %188, %200 : vector<2x128xf32>
    %202 = vector.broadcast %65 : f32 to vector<2x128xf32>
    %203 = arith.addf %201, %202 : vector<2x128xf32>
    %c0_31 = arith.constant 0 : index
    %c1_32 = arith.constant 1 : index
    %204 = arith.index_cast %69 : i32 to index
    %c0_33 = arith.constant 0 : index
    %205 = vector.load %arg6[%c0_31, %c1_32, %204, %c0_33] : memref<1x4x2x128xf32, #tpu.memory_space<vmem>>, vector<1x1x2x128xf32>
    %206 = vector.shape_cast %205 : vector<1x1x2x128xf32> to vector<2x128xf32>
    %207 = vector.shape_cast %203 : vector<2x128xf32> to vector<1x1x2x128xf32>
    tpu.vector_store %arg6[%c0_31, %c1_32, %204, %c0_33], %207 {strides = array<i32>} : memref<1x4x2x128xf32, #tpu.memory_space<vmem>>, vector<1x1x2x128xf32>,
    %208 = vector.broadcast %32 : f32 to vector<2x128xf32>
    %209 = arith.mulf %208, %84 : vector<2x128xf32>
    %210 = vector.broadcast %33 : f32 to vector<2x128xf32>
    %211 = arith.mulf %210, %87 : vector<2x128xf32>
    %212 = arith.addf %209, %211 : vector<2x128xf32>
    %213 = vector.broadcast %34 : f32 to vector<2x128xf32>
    %214 = arith.mulf %213, %90 : vector<2x128xf32>
    %215 = arith.addf %212, %214 : vector<2x128xf32>
    %216 = vector.broadcast %35 : f32 to vector<2x128xf32>
    %217 = arith.mulf %216, %93 : vector<2x128xf32>
    %218 = arith.addf %215, %217 : vector<2x128xf32>
    %219 = arith.mulf %72, %218 : vector<2x128xf32>
    %220 = vector.broadcast %36 : f32 to vector<2x128xf32>
    %221 = arith.mulf %220, %84 : vector<2x128xf32>
    %222 = vector.broadcast %37 : f32 to vector<2x128xf32>
    %223 = arith.mulf %222, %87 : vector<2x128xf32>
    %224 = arith.addf %221, %223 : vector<2x128xf32>
    %225 = vector.broadcast %38 : f32 to vector<2x128xf32>
    %226 = arith.mulf %225, %90 : vector<2x128xf32>
    %227 = arith.addf %224, %226 : vector<2x128xf32>
    %228 = vector.broadcast %39 : f32 to vector<2x128xf32>
    %229 = arith.mulf %228, %93 : vector<2x128xf32>
    %230 = arith.addf %227, %229 : vector<2x128xf32>
    %231 = arith.mulf %75, %230 : vector<2x128xf32>
    %232 = arith.addf %219, %231 : vector<2x128xf32>
    %233 = vector.broadcast %40 : f32 to vector<2x128xf32>
    %234 = arith.mulf %233, %84 : vector<2x128xf32>
    %235 = vector.broadcast %41 : f32 to vector<2x128xf32>
    %236 = arith.mulf %235, %87 : vector<2x128xf32>
    %237 = arith.addf %234, %236 : vector<2x128xf32>
    %238 = vector.broadcast %42 : f32 to vector<2x128xf32>
    %239 = arith.mulf %238, %90 : vector<2x128xf32>
    %240 = arith.addf %237, %239 : vector<2x128xf32>
    %241 = vector.broadcast %43 : f32 to vector<2x128xf32>
    %242 = arith.mulf %241, %93 : vector<2x128xf32>
    %243 = arith.addf %240, %242 : vector<2x128xf32>
    %244 = arith.mulf %78, %243 : vector<2x128xf32>
    %245 = arith.addf %232, %244 : vector<2x128xf32>
    %246 = vector.broadcast %44 : f32 to vector<2x128xf32>
    %247 = arith.mulf %246, %84 : vector<2x128xf32>
    %248 = vector.broadcast %45 : f32 to vector<2x128xf32>
    %249 = arith.mulf %248, %87 : vector<2x128xf32>
    %250 = arith.addf %247, %249 : vector<2x128xf32>
    %251 = vector.broadcast %46 : f32 to vector<2x128xf32>
    %252 = arith.mulf %251, %90 : vector<2x128xf32>
    %253 = arith.addf %250, %252 : vector<2x128xf32>
    %254 = vector.broadcast %47 : f32 to vector<2x128xf32>
    %255 = arith.mulf %254, %93 : vector<2x128xf32>
    %256 = arith.addf %253, %255 : vector<2x128xf32>
    %257 = arith.mulf %81, %256 : vector<2x128xf32>
    %258 = arith.addf %245, %257 : vector<2x128xf32>
    %259 = vector.broadcast %66 : f32 to vector<2x128xf32>
    %260 = arith.addf %258, %259 : vector<2x128xf32>
    %c0_34 = arith.constant 0 : index
    %c2_35 = arith.constant 2 : index
    %261 = arith.index_cast %69 : i32 to index
    %c0_36 = arith.constant 0 : index
    %262 = vector.load %arg6[%c0_34, %c2_35, %261, %c0_36] : memref<1x4x2x128xf32, #tpu.memory_space<vmem>>, vector<1x1x2x128xf32>
    %263 = vector.shape_cast %262 : vector<1x1x2x128xf32> to vector<2x128xf32>
    %264 = vector.shape_cast %260 : vector<2x128xf32> to vector<1x1x2x128xf32>
    tpu.vector_store %arg6[%c0_34, %c2_35, %261, %c0_36], %264 {strides = array<i32>} : memref<1x4x2x128xf32, #tpu.memory_space<vmem>>, vector<1x1x2x128xf32>,
    %265 = vector.broadcast %48 : f32 to vector<2x128xf32>
    %266 = arith.mulf %265, %84 : vector<2x128xf32>
    %267 = vector.broadcast %49 : f32 to vector<2x128xf32>
    %268 = arith.mulf %267, %87 : vector<2x128xf32>
    %269 = arith.addf %266, %268 : vector<2x128xf32>
    %270 = vector.broadcast %50 : f32 to vector<2x128xf32>
    %271 = arith.mulf %270, %90 : vector<2x128xf32>
    %272 = arith.addf %269, %271 : vector<2x128xf32>
    %273 = vector.broadcast %51 : f32 to vector<2x128xf32>
    %274 = arith.mulf %273, %93 : vector<2x128xf32>
    %275 = arith.addf %272, %274 : vector<2x128xf32>
    %276 = arith.mulf %72, %275 : vector<2x128xf32>
    %277 = vector.broadcast %52 : f32 to vector<2x128xf32>
    %278 = arith.mulf %277, %84 : vector<2x128xf32>
    %279 = vector.broadcast %53 : f32 to vector<2x128xf32>
    %280 = arith.mulf %279, %87 : vector<2x128xf32>
    %281 = arith.addf %278, %280 : vector<2x128xf32>
    %282 = vector.broadcast %54 : f32 to vector<2x128xf32>
    %283 = arith.mulf %282, %90 : vector<2x128xf32>
    %284 = arith.addf %281, %283 : vector<2x128xf32>
    %285 = vector.broadcast %55 : f32 to vector<2x128xf32>
    %286 = arith.mulf %285, %93 : vector<2x128xf32>
    %287 = arith.addf %284, %286 : vector<2x128xf32>
    %288 = arith.mulf %75, %287 : vector<2x128xf32>
    %289 = arith.addf %276, %288 : vector<2x128xf32>
    %290 = vector.broadcast %56 : f32 to vector<2x128xf32>
    %291 = arith.mulf %290, %84 : vector<2x128xf32>
    %292 = vector.broadcast %57 : f32 to vector<2x128xf32>
    %293 = arith.mulf %292, %87 : vector<2x128xf32>
    %294 = arith.addf %291, %293 : vector<2x128xf32>
    %295 = vector.broadcast %58 : f32 to vector<2x128xf32>
    %296 = arith.mulf %295, %90 : vector<2x128xf32>
    %297 = arith.addf %294, %296 : vector<2x128xf32>
    %298 = vector.broadcast %59 : f32 to vector<2x128xf32>
    %299 = arith.mulf %298, %93 : vector<2x128xf32>
    %300 = arith.addf %297, %299 : vector<2x128xf32>
    %301 = arith.mulf %78, %300 : vector<2x128xf32>
    %302 = arith.addf %289, %301 : vector<2x128xf32>
    %303 = vector.broadcast %60 : f32 to vector<2x128xf32>
    %304 = arith.mulf %303, %84 : vector<2x128xf32>
    %305 = vector.broadcast %61 : f32 to vector<2x128xf32>
    %306 = arith.mulf %305, %87 : vector<2x128xf32>
    %307 = arith.addf %304, %306 : vector<2x128xf32>
    %308 = vector.broadcast %62 : f32 to vector<2x128xf32>
    %309 = arith.mulf %308, %90 : vector<2x128xf32>
    %310 = arith.addf %307, %309 : vector<2x128xf32>
    %311 = vector.broadcast %63 : f32 to vector<2x128xf32>
    %312 = arith.mulf %311, %93 : vector<2x128xf32>
    %313 = arith.addf %310, %312 : vector<2x128xf32>
    %314 = arith.mulf %81, %313 : vector<2x128xf32>
    %315 = arith.addf %302, %314 : vector<2x128xf32>
    %316 = vector.broadcast %67 : f32 to vector<2x128xf32>
    %317 = arith.addf %315, %316 : vector<2x128xf32>
    %c0_37 = arith.constant 0 : index
    %c3_38 = arith.constant 3 : index
    %318 = arith.index_cast %69 : i32 to index
    %c0_39 = arith.constant 0 : index
    %319 = vector.load %arg6[%c0_37, %c3_38, %318, %c0_39] : memref<1x4x2x128xf32, #tpu.memory_space<vmem>>, vector<1x1x2x128xf32>
    %320 = vector.shape_cast %319 : vector<1x1x2x128xf32> to vector<2x128xf32>
    %321 = vector.shape_cast %317 : vector<2x128xf32> to vector<1x1x2x128xf32>
    tpu.vector_store %arg6[%c0_37, %c3_38, %318, %c0_39], %321 {strides = array<i32>} : memref<1x4x2x128xf32, #tpu.memory_space<vmem>>, vector<1x1x2x128xf32>,
    %c1_i32 = arith.constant 1 : i32
    return
  }
  func.func @transform_0(%arg0: i32, %arg1: i32) -> i32 {
    %c0_i32 = arith.constant 0 : i32
    %c0_i32_0 = arith.constant 0 : i32
    return %c0_i32 : i32
  }
  func.func @transform_1(%arg0: i32, %arg1: i32) -> i32 {
    %c0_i32 = arith.constant 0 : i32
    %c0_i32_0 = arith.constant 0 : i32
    return %c0_i32 : i32
  }
  func.func @transform_2(%arg0: i32, %arg1: i32) -> (i32, i32, i32, i32) {
    %c0_i32 = arith.constant 0 : i32
    %c0_i32_0 = arith.constant 0 : i32
    %c0_i32_1 = arith.constant 0 : i32
    return %arg0, %c0_i32, %arg1, %c0_i32_0 : i32, i32, i32, i32
  }
  func.func @transform_3(%arg0: i32, %arg1: i32) -> (i32, i32, i32, i32) {
    %c0_i32 = arith.constant 0 : i32
    %c0_i32_0 = arith.constant 0 : i32
    %c0_i32_1 = arith.constant 0 : i32
    return %arg0, %c0_i32, %arg1, %c0_i32_0 : i32, i32, i32, i32
  }
  func.func @transform_4(%arg0: i32, %arg1: i32) -> (i32, i32, i32, i32) {
    %c0_i32 = arith.constant 0 : i32
    %c0_i32_0 = arith.constant 0 : i32
    %c0_i32_1 = arith.constant 0 : i32
    return %arg0, %c0_i32, %arg1, %c0_i32_0 : i32, i32, i32, i32
  }
}

</mosaic_0001>

<bundles_post_ra>
// kernel: tpu_custom_call.1
= control target key start
LH: loop header
LB: loop body
LE: loop exit
PB: predicated region body
PF: predicated region fallthrough
CT: control target
= control target key end

     0   :  { %s1573_s0 = inlined_call_operand.hbm [shape: f32[64], index: 0, kind: input, shape index: {}]   ;;  %s1574_s1 = inlined_call_operand.vmem [shape: f32[4], index: 1, kind: input, shape index: {}]   ;;  %s1575_s2 = inlined_call_operand.hbm [shape: f32[2,4,2,128], index: 2, kind: input, shape index: {}]   ;;  %s1576_s3 = inlined_call_operand.hbm [shape: f32[2,4,2,128], index: 3, kind: input, shape index: {}]   ;;  %s1577_s4 = inlined_call_operand.hbm [shape: f32[2,4,2,128], index: 4, kind: output, shape index: {}]  }
   0x1   :  { %1581 = sst [smem:[#allocation19_spill]] %s1573_s0 }
   0x2   :  { %1582 = sst [smem:[#allocation20_spill]] %s1574_s1 }
   0x3   :  { %1583 = sst [smem:[#allocation21_spill]] %s1575_s2 }
   0x4   :  { %9 = vsyncpa [#allocation5], 0 }
   0x5   :  { %10 = vsyncpa [#allocation6], 0 }
   0x6   :  { %11 = vsyncpa [#allocation3], 0 }
   0x7   :  { %13 = vsyncpa [#allocation3 + $0x1], 0 }
   0x8   :  { %14 = vsyncpa [#allocation10], 0 }
   0x9   :  { %16 = vsyncpa [#allocation10 + $0x1], 0 }
   0xa   :  { %17 = vsyncpa [#allocation4], 0 }
   0xb   :  { %19 = vsyncpa [#allocation4 + $0x1], 0  ;;  %s1166_s15 = smov 0   ;;  %s1168_s16 = smov 0  }
   0xc   :  { %s1170_s17 = smov 0   ;;  %s1172_s18 = smov 0  }
   0xd   :  { %s1174_s19 = smov 0   ;;  %s1176_s20 = smov 0  }
   0xe LB: > { %s763_s21 = sadd.s32 4294967295, %s1130_s20   ;;  %s764_s22 = sadd.s32 4294967294, %s1130_s20   ;;  %s1130_s20 = sphi %s1176_s20, %s25_s20   ;;  %s1126_s19 = sphi %s1174_s19, %s1606_s19   ;;  %s1122_s18 = sphi %s1172_s18, %s1605_s18   ;;  %s1118_s17 = sphi %s1170_s17, %s1604_s17   ;;  %s1114_s16 = sphi %s1168_s16, %s1603_s16   ;;  %s1110_s15 = sphi %s1166_s15, %s1602_s15  }
   0xf   : > { %s88_s23 = sadd.s32 1, %s1118_s17  ;;  %p95_p0 = scmp.ne.s32.totalorder %s1118_s17, %s1114_s16 }
  0x10   : > { %p96_p1 = scmp.eq.s32.totalorder %s1130_s20, 0  ;;  %p101_p2 = scmp.ne.s32.totalorder %s1114_s16, %s1110_s15 }
  0x11   : > { %p1204_p3 = scmp.eq.s32.totalorder %s763_s21, 0  ;;  %p155_p4 = scmp.eq.s32.totalorder %s763_s21, 1 }
  0x12   : > { %p97_p5 = por %p96_p1, %p95_p0  ;;  %p161_p6 = scmp.eq.s32.totalorder %s764_s22, 1 }
  0x13   : > { %p1210_p7 = por %p1204_p3, %p101_p2  ;;  %p1214_p8 = por %p155_p4, %p95_p0 }
  0x14   : > { %p1218_p9 = por %p161_p6, %p101_p2  ;;  %p765_p10 = scmp.ge.s32.totalorder %s1130_s20, 1 }
  0x15   : > { %p168_p11 = scmp.lt.s32.totalorder %s1130_s20, 3  ;;  %p898_p1 = scmp.lt.s32.totalorder %s1130_s20, 2 }
  0x16   : > { %s1587_s27 = scalar_select %p1218_p9, 1, 0 }
  0x17   : > { %p1225_p13 = pnand %p765_p10, %p168_p11  ;;  %s1589_s1 = sld [smem:[#allocation20_spill]] }
  0x18   : > { %p1235_p4 = pnand %p898_p1, %p97_p5  ;;  %s1246_s8 = sand.u32 1, %s1118_s17  }
  0x19   : > { %p878_p0 = pneg %p1225_p13  ;;  %s37_s9 = sadd.s32 1, %s1126_s19 }
  0x1a   : > { %s1132_s10 = smov [#allocation2]   ;;  %s1592_s0 = sld [smem:[#allocation19_spill]] }
  0x1b   : > { %p1241_p2 = pnand %p878_p0, %p1204_p3 }
  0x1d   : > { %s190_s5 = sshll.u32 %s1589_s1, 4  ;;  %p969_p6 = pneg %p1241_p2  ;;  %s191_s5 = int_to_ptr.vmem [resolvable:$true] %s190_s5 }
  0x1e   : > { %s967_s13 = scalar_lea.vmem %s191_s5, 16  ;;  %p975_p1 = scmp.lt.s32.totalorder %s191_s5, %s191_s5 }
  0x1f   : > { %p968_p5 = scmp.ne.s32.totalorder %s191_s5, %s967_s13  ;;  %p976_p0 = scmp.lt.s32.totalorder %s967_s13, %s967_s13 }
  0x20   : > { %881 = dma.hbm_to_smem (!%p1241_p2), %s1592_s0, 16, %s1132_s10, [#allocation5]  }
  0x21   : > { %p970_p10 = pnand %p969_p6, %p968_p5  ;;  %p977_p12 = por %p976_p0, %p975_p1 }
  0x23   : > { %p971_p11 = pneg %p970_p10 }
  0x25   : > { %p978_p9 = pnand %p977_p12, %p971_p11 }
  0x27   : > { %981 = shalt.err (!%p978_p9)
}
  0x28   : > { %s1133_s14 = smov [#allocation7]   ;;  %p39_p5 = scmp.ge.s32.totalorder %s37_s9, 2 }
  0x29   : > { %884 = dma.vmem_to_smem (!%p1241_p2), %s191_s5, 16, %s1133_s14, [#allocation6]  }
  0x2a   : > { %s1579_s21 = sshll.u32 %s1246_s8, 3  ;;  %s1578_s22 = sshll.u32 %s1126_s19, 7 }
  0x2b   : > { %s1608_s9 = smov (%p39_p5, %s37_s9), 0  ;;  %s1594_s2 = sld [smem:[#allocation21_spill]] }
  0x2c   : > { %1593 = sst [smem:[#allocation17_spill]] %s1608_s9  ;;  %s83_s10 = ssub.s32 %s1126_s19, %s1608_s9 }
  0x2d   : > { %s205_s11 = scalar_lea.vmem [#allocation8], %s1579_s21  ;;  %p86_p9 = scmp.eq.s32.totalorder %s83_s10, 0 }
  0x2e   : > { %s213_s12 = sshll.u32 %s205_s11, 4  ;;  %s202_s13 = scalar_lea.sflag [#allocation3], %s1246_s8  ;;  %s214_s12 = int_to_ptr.vmem [resolvable:$true] %s213_s12 }
  0x2f   : > { %s1274_s5 = scalar_select %p86_p9, %s1118_s17, %s88_s23  }
  0x30   : > { %p984_p12 = pneg %p1235_p4  ;;  %s995_s14 = scalar_lea.vmem %s214_s12, 128 }
  0x31   : > { %s212_s7 = scalar_lea.hbm %s1594_s2, %s1578_s22  ;;  %1595 = sst [smem:[#allocation18_spill]] %s1274_s5 }
  0x32   : > { %p996_p2 = scmp.ne.s32.totalorder %s214_s12, %s995_s14  ;;  %s1134_s29 = smov [#allocation8]  }
  0x33   : > { %s1000_s30 = sshll.u32 %s1134_s29, 4  ;;  %s1001_s30 = int_to_ptr.vmem [resolvable:$false] %s1000_s30 }
  0x34   : > { %p998_p6 = pnand %p996_p2, %p984_p12  ;;  %s1002_s22 = scalar_lea.vmem %s1001_s30, 256 }
  0x35   : > { %p1003_p11 = scmp.lt.s32.totalorder %s214_s12, %s1001_s30  ;;  %p1004_p1 = scmp.lt.s32.totalorder %s1002_s22, %s995_s14 }
  0x36   : > { %p999_p10 = pneg %p998_p6 }
  0x37   : > { %p1005_p0 = por %p1004_p1, %p1003_p11 }
  0x39   : > { %p1006_p5 = pnand %p1005_p0, %p999_p10 }
  0x3b   : > { %1009 = shalt.err (!%p1006_p5)
}
  0x3c   : > { %s1135_s23 = smov 32   ;;  %s1136_s10 = smov 2  }
  0x3d   : > { %888 = dma.hbm_to_vmem [thread:$0]  (!%p1235_p4), %s212_s7, 128, %s214_s12, %s202_s13, %s1135_s23, %s1135_s23, %s1136_s10  }
  0x3e   : > { %s1596_s11 = sshll.u32 %s1126_s19, 7  ;;  %s1597_s1 = sshll.u32 %s1246_s8, 3 }
  0x3f   : > { %s234_s29 = scalar_lea.hbm %s1576_s3, %s1596_s11  ;;  %s227_s30 = scalar_lea.vmem [#allocation9], %s1597_s1 }
  0x40   : > { %s235_s22 = sshll.u32 %s227_s30, 4  ;;  %s224_s14 = scalar_lea.sflag [#allocation10], %s1246_s8  ;;  %s236_s22 = int_to_ptr.vmem [resolvable:$true] %s235_s22 }
  0x41   : > { %s1023_s2 = scalar_lea.vmem %s236_s22, 128  ;;  %s1137_s9 = smov [#allocation9]  }
  0x42   : > { %p1024_p9 = scmp.ne.s32.totalorder %s236_s22, %s1023_s2  ;;  %s1028_s5 = sshll.u32 %s1137_s9, 4  ;;  %s1029_s5 = int_to_ptr.vmem [resolvable:$false] %s1028_s5 }
  0x43   : > { %s1030_s7 = scalar_lea.vmem %s1029_s5, 256  ;;  %p1031_p10 = scmp.lt.s32.totalorder %s236_s22, %s1029_s5 }
  0x44   : > { %p1026_p2 = pnand %p1024_p9, %p984_p12  ;;  %p1032_p11 = scmp.lt.s32.totalorder %s1030_s7, %s1023_s2 }
  0x46   : > { %p1027_p6 = pneg %p1026_p2  ;;  %p1033_p1 = por %p1032_p11, %p1031_p10 }
  0x48   : > { %p1034_p0 = pnand %p1033_p1, %p1027_p6 }
  0x4a   : > { %1037 = shalt.err (!%p1034_p0)
}
  0x4b   : > { %891 = dma.hbm_to_vmem [thread:$0]  (!%p1235_p4), %s234_s29, 128, %s236_s22, %s224_s14, %s1135_s23, %s1135_s23, %s1136_s10  }
  0x4c   : > { %247 = sbr.rel (%p1225_p13) target bundleno = 191 (0xbf), region = 36 }
  0x51   : > { %1089 = dma.done.wait (%p1204_p3), [#allocation5], 16  }
  0x52   : > { %1091 = vsyncadd (%p1204_p3), [#allocation5], 4294967280 }
  0x53   : > { %1093 = dma.done.wait (%p1204_p3), [#allocation6], 16  }
  0x54   : > { %1095 = vsyncadd (%p1204_p3), [#allocation6], 4294967280  ;;  %s1308_s0 = sand.u32 1, %s1114_s16  }
  0x55   : > { %s1311_s1 = sshll.u32 %s1308_s0, 3  ;;  %s258_s2 = scalar_lea.sflag [#allocation3], %s1308_s0 }
  0x56   : > { %s1315_s28 = scalar_lea.vmem [#allocation8], %s1311_s1 }
  0x57   : > { %1097 = dma.done.wait (%p1210_p7), %s258_s2, 128  }
  0x58   : > { %1099 = vsyncadd (%p1210_p7), %s258_s2, 4294967168  ;;  %s267_s24 = scalar_lea.sflag [#allocation10], %s1308_s0  ;;  %s270_s6 = scalar_lea.vmem [#allocation9], %s1311_s1 }
  0x59   : > { %1101 = dma.done.wait (%p1210_p7), %s267_s24, 128  }
  0x5a   : > { %1103 = vsyncadd (%p1210_p7), %s267_s24, 4294967168 }
  0x5b   : > { %275 = sfence }
  0x5c   : > { %s301_s8 = sld [smem:[#allocation2]]  ;;  %v1327_v0 = vld [vmem:[%s270_s6] sm:$0x3]  ;;  %v1329_v1 = vld [vmem:[%s270_s6 + $0x2] sm:$0x3] }
  0x5d   : > { %s781_s9 = sld [smem:[#allocation2 + $0x1]]  ;;  %v1331_v2 = vld [vmem:[%s270_s6 + $0x4] sm:$0x3]  ;;  %v1333_v4 = vld [vmem:[%s270_s6 + $0x6] sm:$0x3] }
  0x5e   : > { %s782_s21 = sld [smem:[#allocation2 + $0x2]]  ;;  %v1347_v21 = vld [vmem:[%s1315_s28] sm:$0x3]  ;;  %v1357_v31 = vld [vmem:[%s1315_s28 + $0x2] sm:$0x3] }
  0x5f   : > { %s783_s12 = sld [smem:[#allocation2 + $0x3]]  ;;  %v1368_v45 = vld [vmem:[%s1315_s28 + $0x4] sm:$0x3]  ;;  %v1380_v57 = vld [vmem:[%s1315_s28 + $0x6] sm:$0x3] }
  0x60   : > { %s784_s5 = sld [smem:[#allocation2 + $0x4]] }
  0x61   : > { %s785_s13 = sld [smem:[#allocation2 + $0x5]] }
  0x62   : > { %s786_s23 = sld [smem:[#allocation2 + $0x6]]  ;;  %v386_v3 = vstv %s301_s8 }
  0x63   : > { %s787_s10 = sld [smem:[#allocation2 + $0x7]]  ;;  %v387_v5 = vmul.f32 %v386_v3, %v1327_v0  ;;  %v388_v6 = vstv %s781_s9 }
  0x64   : > { %s788_s25 = sld [smem:[#allocation2 + $0x8]]  ;;  %v389_v7 = vmul.f32 %v1329_v1, %v388_v6  ;;  %v391_v8 = vstv %s782_s21 }
  0x65   : > { %s789_s11 = sld [smem:[#allocation2 + $0x9]]  ;;  %v392_v9 = vmul.f32 %v1331_v2, %v391_v8  ;;  %v394_v10 = vstv %s783_s12 }
  0x66   : > { %s790_s29 = sld [smem:[#allocation2 + $0xa]]  ;;  %v390_v11 = vadd.f32 %v389_v7, %v387_v5  ;;  %v395_v12 = vmul.f32 %v1333_v4, %v394_v10  ;;  %v398_v13 = vstv %s784_s5 }
  0x67   : > { %s791_s30 = sld [smem:[#allocation2 + $0xb]]  ;;  %v399_v14 = vmul.f32 %v398_v13, %v1327_v0  ;;  %v400_v15 = vstv %s785_s13 }
  0x68   : > { %s792_s22 = sld [smem:[#allocation2 + $0xc]]  ;;  %v393_v16 = vadd.f32 %v392_v9, %v390_v11  ;;  %v401_v17 = vmul.f32 %v1329_v1, %v400_v15  ;;  %v403_v18 = vstv %s786_s23 }
  0x69   : > { %s1341_s14 = sld [smem:[#allocation2 + $0xd]]  ;;  %v404_v19 = vmul.f32 %v1331_v2, %v403_v18  ;;  %v406_v20 = vstv %s787_s10 }
  0x6a   : > { %s1344_s7 = sld [smem:[#allocation2 + $0xe]]  ;;  %v396_v22 = vadd.f32 %v395_v12, %v393_v16  ;;  %v402_v23 = vadd.f32 %v401_v17, %v399_v14  ;;  %v407_v24 = vmul.f32 %v1333_v4, %v406_v20  ;;  %v411_v25 = vstv %s788_s25 }
  0x6b   : > { %s1350_s2 = sld [smem:[#allocation2 + $0xf]]  ;;  %v412_v26 = vmul.f32 %v411_v25, %v1327_v0  ;;  %v413_v27 = vstv %s789_s11 }
  0x6c   : > { %s1353_s24 = sld [smem:[#allocation7]]  ;;  %v405_v28 = vadd.f32 %v404_v19, %v402_v23  ;;  %v414_v29 = vmul.f32 %v1329_v1, %v413_v27  ;;  %v416_v30 = vstv %s790_s29  ;;  %v397_v32 = vmul.f32 %v396_v22, %v1347_v21 }
  0x6d   : > { %v417_v33 = vmul.f32 %v1331_v2, %v416_v30  ;;  %v419_v34 = vstv %s791_s30  ;;  %s796_s6 = sld [smem:[#allocation2 + $0x10]] }
  0x6e   : > { %v408_v35 = vadd.f32 %v407_v24, %v405_v28  ;;  %v415_v36 = vadd.f32 %v414_v29, %v412_v26  ;;  %v420_v37 = vmul.f32 %v1333_v4, %v419_v34  ;;  %v424_v38 = vstv %s792_s22  ;;  %s797_s8 = sld [smem:[#allocation2 + $0x11]] }
  0x6f   : > { %v425_v39 = vmul.f32 %v424_v38, %v1327_v0  ;;  %v426_v40 = vstv %s1341_s14  ;;  %s798_s9 = sld [smem:[#allocation2 + $0x12]] }
  0x70   : > { %v409_v41 = vmul.f32 %v1357_v31, %v408_v35  ;;  %v418_v42 = vadd.f32 %v417_v33, %v415_v36  ;;  %v427_v43 = vmul.f32 %v1329_v1, %v426_v40  ;;  %v429_v44 = vstv %s1344_s7  ;;  %s799_s21 = sld [smem:[#allocation2 + $0x13]] }
  0x71   : > { %v430_v46 = vmul.f32 %v1331_v2, %v429_v44  ;;  %v432_v47 = vstv %s1350_s2  ;;  %s800_s12 = sld [smem:[#allocation2 + $0x14]]  ;;  %s1417_s2 = scalar_lea.vmem [#allocation11], %s1311_s1 }
  0x72   : > { %v410_v48 = vadd.f32 %v409_v41, %v397_v32  ;;  %v421_v49 = vadd.f32 %v420_v37, %v418_v42  ;;  %v428_v50 = vadd.f32 %v427_v43, %v425_v39  ;;  %v433_v51 = vmul.f32 %v1333_v4, %v432_v47  ;;  %s801_s5 = sld [smem:[#allocation2 + $0x15]] }
  0x73   : > { %s1373_s13 = sld [smem:[#allocation2 + $0x16]]  ;;  %v440_v52 = vstv %s796_s6  ;;  %v437_v10 = vstv %s1353_s24 }
  0x74   : > { %v422_v53 = vmul.f32 %v1368_v45, %v421_v49  ;;  %v431_v54 = vadd.f32 %v430_v46, %v428_v50  ;;  %s1376_s23 = sld [smem:[#allocation2 + $0x17]]  ;;  %v441_v55 = vmul.f32 %v440_v52, %v1327_v0  ;;  %v442_v56 = vstv %s797_s8 }
  0x75   : > { %s1382_s10 = sld [smem:[#allocation2 + $0x18]]  ;;  %v443_v58 = vmul.f32 %v1329_v1, %v442_v56  ;;  %v445_v59 = vstv %s798_s9 }
  0x76   : > { %v423_v60 = vadd.f32 %v422_v53, %v410_v48  ;;  %v434_v61 = vadd.f32 %v433_v51, %v431_v54  ;;  %s1385_s25 = sld [smem:[#allocation2 + $0x19]]  ;;  %v446_v62 = vmul.f32 %v1331_v2, %v445_v59  ;;  %v448_v63 = vstv %s799_s21 }
  0x77   : > { %s1388_s11 = sld [smem:[#allocation2 + $0x1a]]  ;;  %v444_v3 = vadd.f32 %v443_v58, %v441_v55  ;;  %v449_v5 = vmul.f32 %v1333_v4, %v448_v63  ;;  %v452_v6 = vstv %s800_s12 }
  0x78   : > { %v435_v7 = vmul.f32 %v1380_v57, %v434_v61  ;;  %s1392_s28 = sld [smem:[#allocation2 + $0x1b]]  ;;  %v453_v8 = vmul.f32 %v452_v6, %v1327_v0  ;;  %v454_v9 = vstv %s801_s5 }
  0x79   : > { %s1396_s29 = sld [smem:[#allocation2 + $0x1c]]  ;;  %v447_v11 = vadd.f32 %v446_v62, %v444_v3  ;;  %v455_v12 = vmul.f32 %v1329_v1, %v454_v9  ;;  %v457_v13 = vstv %s1373_s13 }
  0x7a   : > { %v436_v14 = vadd.f32 %v435_v7, %v423_v60  ;;  %s1400_s30 = sld [smem:[#allocation2 + $0x1d]]  ;;  %v458_v15 = vmul.f32 %v1331_v2, %v457_v13  ;;  %v460_v16 = vstv %s1376_s23 }
  0x7b   : > { %s1404_s22 = sld [smem:[#allocation2 + $0x1e]]  ;;  %v450_v17 = vadd.f32 %v449_v5, %v447_v11  ;;  %v456_v18 = vadd.f32 %v455_v12, %v453_v8  ;;  %v461_v19 = vmul.f32 %v1333_v4, %v460_v16  ;;  %v465_v20 = vstv %s1382_s10 }
  0x7c   : > { %v438_v22 = vadd.f32 %v437_v10, %v436_v14  ;;  %s1408_s14 = sld [smem:[#allocation2 + $0x1f]]  ;;  %v466_v23 = vmul.f32 %v465_v20, %v1327_v0  ;;  %v467_v24 = vstv %s1385_s25 }
  0x7d   : > { %s1412_s7 = sld [smem:[#allocation7 + $0x1]]  ;;  %v459_v25 = vadd.f32 %v458_v15, %v456_v18  ;;  %v468_v26 = vmul.f32 %v1329_v1, %v467_v24  ;;  %v470_v27 = vstv %s1388_s11  ;;  %v451_v28 = vmul.f32 %v450_v17, %v1347_v21 }
  0x7e   : > { %439 = vst [vmem:[%s1417_s2] sm:$0x3] %v438_v22  ;;  %v471_v29 = vmul.f32 %v1331_v2, %v470_v27  ;;  %v473_v30 = vstv %s1392_s28  ;;  %s812_s24 = sld [smem:[#allocation2 + $0x20]] }
  0x7f   : > { %v462_v32 = vadd.f32 %v461_v19, %v459_v25  ;;  %v469_v33 = vadd.f32 %v468_v26, %v466_v23  ;;  %v474_v34 = vmul.f32 %v1333_v4, %v473_v30  ;;  %v478_v35 = vstv %s1396_s29  ;;  %s813_s6 = sld [smem:[#allocation2 + $0x21]] }
  0x80   : > { %v479_v36 = vmul.f32 %v478_v35, %v1327_v0  ;;  %v480_v37 = vstv %s1400_s30  ;;  %s814_s1 = sld [smem:[#allocation2 + $0x22]] }
  0x81   : > { %v463_v38 = vmul.f32 %v1357_v31, %v462_v32  ;;  %v472_v39 = vadd.f32 %v471_v29, %v469_v33  ;;  %v481_v40 = vmul.f32 %v1329_v1, %v480_v37  ;;  %v483_v41 = vstv %s1404_s22  ;;  %s815_s8 = sld [smem:[#allocation2 + $0x23]] }
  0x82   : > { %v484_v42 = vmul.f32 %v1331_v2, %v483_v41  ;;  %v486_v43 = vstv %s1408_s14  ;;  %s816_s9 = sld [smem:[#allocation2 + $0x24]] }
  0x83   : > { %v464_v44 = vadd.f32 %v463_v38, %v451_v28  ;;  %v475_v46 = vadd.f32 %v474_v34, %v472_v39  ;;  %v482_v47 = vadd.f32 %v481_v40, %v479_v36  ;;  %v487_v48 = vmul.f32 %v1333_v4, %v486_v43  ;;  %s817_s21 = sld [smem:[#allocation2 + $0x25]] }
  0x84   : > { %s818_s12 = sld [smem:[#allocation2 + $0x26]]  ;;  %v495_v49 = vstv %s812_s24  ;;  %v491_v7 = vstv %s1412_s7 }
  0x85   : > { %v476_v50 = vmul.f32 %v1368_v45, %v475_v46  ;;  %v485_v51 = vadd.f32 %v484_v42, %v482_v47  ;;  %s1434_s5 = sld [smem:[#allocation2 + $0x27]]  ;;  %v496_v52 = vmul.f32 %v495_v49, %v1327_v0  ;;  %v497_v53 = vstv %s813_s6 }
  0x86   : > { %s1437_s13 = sld [smem:[#allocation2 + $0x28]]  ;;  %v498_v54 = vmul.f32 %v1329_v1, %v497_v53  ;;  %v500_v55 = vstv %s814_s1 }
  0x87   : > { %v477_v56 = vadd.f32 %v476_v50, %v464_v44  ;;  %v488_v58 = vadd.f32 %v487_v48, %v485_v51  ;;  %s1440_s23 = sld [smem:[#allocation2 + $0x29]]  ;;  %v501_v59 = vmul.f32 %v1331_v2, %v500_v55  ;;  %v503_v60 = vstv %s815_s8 }
  0x88   : > { %s1443_s10 = sld [smem:[#allocation2 + $0x2a]]  ;;  %v499_v61 = vadd.f32 %v498_v54, %v496_v52  ;;  %v504_v62 = vmul.f32 %v1333_v4, %v503_v60  ;;  %v507_v63 = vstv %s816_s9 }
  0x89   : > { %v489_v3 = vmul.f32 %v1380_v57, %v488_v58  ;;  %s1447_s25 = sld [smem:[#allocation2 + $0x2b]]  ;;  %v508_v5 = vmul.f32 %v507_v63, %v1327_v0  ;;  %v509_v6 = vstv %s817_s21 }
  0x8a   : > { %s1451_s11 = sld [smem:[#allocation2 + $0x2c]]  ;;  %v502_v8 = vadd.f32 %v501_v59, %v499_v61  ;;  %v510_v9 = vmul.f32 %v1329_v1, %v509_v6  ;;  %v512_v10 = vstv %s818_s12 }
  0x8b   : > { %v490_v11 = vadd.f32 %v489_v3, %v477_v56  ;;  %s1454_s28 = sld [smem:[#allocation2 + $0x2d]]  ;;  %v513_v12 = vmul.f32 %v1331_v2, %v512_v10  ;;  %v515_v13 = vstv %s1434_s5 }
  0x8c   : > { %s1458_s29 = sld [smem:[#allocation2 + $0x2e]]  ;;  %v505_v14 = vadd.f32 %v504_v62, %v502_v8  ;;  %v511_v15 = vadd.f32 %v510_v9, %v508_v5  ;;  %v516_v16 = vmul.f32 %v1333_v4, %v515_v13  ;;  %v520_v17 = vstv %s1437_s13 }
  0x8d   : > { %v492_v18 = vadd.f32 %v491_v7, %v490_v11  ;;  %s1462_s30 = sld [smem:[#allocation2 + $0x2f]]  ;;  %v521_v19 = vmul.f32 %v520_v17, %v1327_v0  ;;  %v522_v20 = vstv %s1440_s23 }
  0x8e   : > { %s1466_s22 = sld [smem:[#allocation7 + $0x2]]  ;;  %v514_v22 = vadd.f32 %v513_v12, %v511_v15  ;;  %v523_v23 = vmul.f32 %v1329_v1, %v522_v20  ;;  %v525_v24 = vstv %s1443_s10  ;;  %v506_v25 = vmul.f32 %v505_v14, %v1347_v21 }
  0x8f   : > { %853 = vst [vmem:[%s1417_s2 + $0x2] sm:$0x3] %v492_v18  ;;  %v526_v26 = vmul.f32 %v1331_v2, %v525_v24  ;;  %v528_v27 = vstv %s1447_s25  ;;  %s828_s14 = sld [smem:[#allocation2 + $0x30]] }
  0x90   : > { %v517_v28 = vadd.f32 %v516_v16, %v514_v22  ;;  %v524_v29 = vadd.f32 %v523_v23, %v521_v19  ;;  %v529_v30 = vmul.f32 %v1333_v4, %v528_v27  ;;  %v533_v32 = vstv %s1451_s11  ;;  %s829_s7 = sld [smem:[#allocation2 + $0x31]] }
  0x91   : > { %v534_v33 = vmul.f32 %v533_v32, %v1327_v0  ;;  %v535_v34 = vstv %s1454_s28  ;;  %s830_s24 = sld [smem:[#allocation2 + $0x32]] }
  0x92   : > { %v518_v35 = vmul.f32 %v1357_v31, %v517_v28  ;;  %v527_v36 = vadd.f32 %v526_v26, %v524_v29  ;;  %v536_v37 = vmul.f32 %v1329_v1, %v535_v34  ;;  %v538_v38 = vstv %s1458_s29  ;;  %s831_s6 = sld [smem:[#allocation2 + $0x33]] }
  0x93   : > { %v539_v39 = vmul.f32 %v1331_v2, %v538_v38  ;;  %v541_v40 = vstv %s1462_s30  ;;  %s832_s1 = sld [smem:[#allocation2 + $0x34]]  ;;  %s620_s30 = sshll.u32 %s1417_s2, 4  ;;  %s1519_s30 = int_to_ptr.vmem [resolvable:$true] %s620_s30 }
  0x94   : > { %v519_v41 = vadd.f32 %v518_v35, %v506_v25  ;;  %v530_v42 = vadd.f32 %v529_v30, %v527_v36  ;;  %v537_v43 = vadd.f32 %v536_v37, %v534_v33  ;;  %v542_v44 = vmul.f32 %v1333_v4, %v541_v40  ;;  %s833_s8 = sld [smem:[#allocation2 + $0x35]] }
  0x95   : > { %s834_s9 = sld [smem:[#allocation2 + $0x36]]  ;;  %v550_v46 = vstv %s828_s14  ;;  %v546_v3 = vstv %s1466_s22  ;;  %s863_s22 = sshll.u32 %s1122_s18, 7 }
  0x96   : > { %v531_v47 = vmul.f32 %v1368_v45, %v530_v42  ;;  %v540_v48 = vadd.f32 %v539_v39, %v537_v43  ;;  %s1485_s21 = sld [smem:[#allocation2 + $0x37]]  ;;  %v551_v49 = vmul.f32 %v550_v46, %v1327_v0  ;;  %v552_v50 = vstv %s829_s7  ;;  %s1138_s18 = smov [#allocation11]  }
  0x97   : > { %s1488_s12 = sld [smem:[#allocation2 + $0x38]]  ;;  %v553_v51 = vmul.f32 %v1329_v1, %v552_v50  ;;  %v555_v52 = vstv %s830_s24  ;;  %s1524_s24 = scalar_lea.hbm %s1577_s4, %s863_s22 }
  0x98   : > { %v532_v53 = vadd.f32 %v531_v47, %v519_v41  ;;  %v543_v54 = vadd.f32 %v542_v44, %v540_v48  ;;  %s837_s5 = sld [smem:[#allocation2 + $0x39]]  ;;  %v556_v55 = vmul.f32 %v1331_v2, %v555_v52  ;;  %v558_v56 = vstv %s831_s6  ;;  %s606_s6 = scalar_lea.sflag [#allocation4], %s1308_s0 }
  0x99   : > { %s1492_s13 = sld [smem:[#allocation2 + $0x3a]]  ;;  %v554_v58 = vadd.f32 %v553_v51, %v551_v49  ;;  %v559_v59 = vmul.f32 %v1333_v4, %v558_v56  ;;  %v562_v60 = vstv %s832_s1  ;;  %s1038_s1 = scalar_lea.vmem %s1519_s30, 128 }
  0x9a   : > { %v544_v61 = vmul.f32 %v1380_v57, %v543_v54  ;;  %s839_s23 = sld [smem:[#allocation2 + $0x3b]]  ;;  %v563_v62 = vmul.f32 %v562_v60, %v1327_v0  ;;  %v564_v63 = vstv %s833_s8  ;;  %p1039_p3 = scmp.ne.s32.totalorder %s1519_s30, %s1038_s1 }
  0x9b   : > { %s840_s10 = sld [smem:[#allocation2 + $0x3c]]  ;;  %v557_v5 = vadd.f32 %v556_v55, %v554_v58  ;;  %v565_v6 = vmul.f32 %v1329_v1, %v564_v63  ;;  %v567_v7 = vstv %s834_s9  ;;  %s1042_s8 = sshll.u32 %s1138_s18, 4  ;;  %s1043_s8 = int_to_ptr.vmem [resolvable:$false] %s1042_s8 }
  0x9c   : > { %v545_v8 = vadd.f32 %v544_v61, %v532_v53  ;;  %s841_s25 = sld [smem:[#allocation2 + $0x3d]]  ;;  %v568_v9 = vmul.f32 %v1331_v2, %v567_v7  ;;  %v570_v10 = vstv %s1485_s21  ;;  %p1040_p7 = pnand %p1039_p3, %p1214_p8 }
  0x9d   : > { %s842_s11 = sld [smem:[#allocation2 + $0x3e]]  ;;  %v560_v11 = vadd.f32 %v559_v59, %v557_v5  ;;  %v566_v12 = vadd.f32 %v565_v6, %v563_v62  ;;  %v571_v13 = vmul.f32 %v1333_v4, %v570_v10  ;;  %v575_v14 = vstv %s1488_s12  ;;  %s1044_s9 = scalar_lea.vmem %s1043_s8, 256 }
  0x9e   : > { %v547_v15 = vadd.f32 %v546_v3, %v545_v8  ;;  %s843_s28 = sld [smem:[#allocation2 + $0x3f]]  ;;  %v576_v16 = vmul.f32 %v575_v14, %v1327_v0  ;;  %v577_v17 = vstv %s837_s5  ;;  %p1041_p13 = pneg %p1040_p7 }
  0x9f   : > { %v569_v18 = vadd.f32 %v568_v9, %v566_v12  ;;  %v578_v19 = vmul.f32 %v1329_v1, %v577_v17  ;;  %v580_v20 = vstv %s1492_s13  ;;  %v561_v22 = vmul.f32 %v560_v11, %v1347_v21  ;;  %s846_s29 = sld [smem:[#allocation7 + $0x3]]  ;;  %p1045_p4 = scmp.lt.s32.totalorder %s1519_s30, %s1043_s8 }
  0xa0   : > { %854 = vst [vmem:[%s1417_s2 + $0x4] sm:$0x3] %v547_v15  ;;  %v581_v23 = vmul.f32 %v1331_v2, %v580_v20  ;;  %v583_v24 = vstv %s839_s23  ;;  %p1046_p12 = scmp.lt.s32.totalorder %s1044_s9, %s1038_s1 }
  0xa1   : > { %v572_v25 = vadd.f32 %v571_v13, %v569_v18  ;;  %v579_v26 = vadd.f32 %v578_v19, %v576_v16  ;;  %v584_v27 = vmul.f32 %v1333_v4, %v583_v24  ;;  %v588_v28 = vstv %s840_s10 }
  0xa2   : > { %v589_v29 = vmul.f32 %v588_v28, %v1327_v0  ;;  %v590_v30 = vstv %s841_s25  ;;  %p1047_p5 = por %p1046_p12, %p1045_p4 }
  0xa3   : > { %v573_v32 = vmul.f32 %v1357_v31, %v572_v25  ;;  %v582_v33 = vadd.f32 %v581_v23, %v579_v26  ;;  %v591_v34 = vmul.f32 %v1329_v1, %v590_v30  ;;  %v593_v35 = vstv %s842_s11 }
  0xa4   : > { %v594_v21 = vmul.f32 %v1331_v2, %v593_v35  ;;  %v596_v36 = vstv %s843_s28  ;;  %p1048_p9 = pnand %p1047_p5, %p1041_p13 }
  0xa5   : > { %v574_v37 = vadd.f32 %v573_v32, %v561_v22  ;;  %v585_v38 = vadd.f32 %v584_v27, %v582_v33  ;;  %v592_v39 = vadd.f32 %v591_v34, %v589_v29  ;;  %v597_v0 = vmul.f32 %v1333_v4, %v596_v36 }
  0xa6   : > { %v601_v43 = vstv %s846_s29 }
  0xa7   : > { %v586_v40 = vmul.f32 %v1368_v45, %v585_v38  ;;  %v595_v31 = vadd.f32 %v594_v21, %v592_v39 }
  0xa9   : > { %v587_v41 = vadd.f32 %v586_v40, %v574_v37  ;;  %v598_v42 = vadd.f32 %v597_v0, %v595_v31 }
  0xab   : > { %v599_v1 = vmul.f32 %v1380_v57, %v598_v42 }
  0xad   : > { %v600_v2 = vadd.f32 %v599_v1, %v587_v41 }
  0xaf   : > { %v602_v4 = vadd.f32 %v601_v43, %v600_v2 }
  0xb1   : > { %855 = vst [vmem:[%s1417_s2 + $0x6] sm:$0x3] %v602_v4 }
  0xb2   : > { %1051 = shalt.err (!%p1048_p9)
}
  0xb3   : > { %s1052_s2 = scalar_lea.hbm %s1524_s24, 128  ;;  %s1056_s5 = scalar_lea.hbm %s1577_s4, 256 }
  0xb4   : > { %p1053_p2 = scmp.ne.s32.totalorder %s1524_s24, %s1052_s2  ;;  %p1057_p11 = scmp.lt.s32.totalorder %s1524_s24, %s1577_s4 }
  0xb5   : > { %p1058_p1 = scmp.lt.s32.totalorder %s1056_s5, %s1052_s2 }
  0xb6   : > { %p1054_p6 = pnand %p1053_p2, %p1214_p8 }
  0xb7   : > { %p1059_p0 = por %p1058_p1, %p1057_p11 }
  0xb8   : > { %p1055_p10 = pneg %p1054_p6 }
  0xba   : > { %p1060_p3 = pnand %p1059_p0, %p1055_p10 }
  0xbc   : > { %1063 = shalt.err (!%p1060_p3)
}
  0xbd   : > { %s1139_s10 = smov 32   ;;  %s1140_s25 = smov 2  }
  0xbe   : > { %876 = dma.vmem_to_hbm [thread:$0]  (%p1214_p8), %s1519_s30, 128, %s1524_s24, %s606_s6, %s1139_s10, %s1139_s10, %s1140_s25  }
  0xbf PF: > { %s635_s11 = sand.u32 1, %s1110_s15   ;;  %p1598_p7 = scmp.ne.s32.totalorder %s1587_s27, 0 }
  0xc0   : > { %p1599_p13 = scmp.ge.s32.totalorder %s1130_s20, 2  ;;  %s636_s28 = scalar_lea.sflag [#allocation4], %s635_s11 }
  0xc2   : > { %p893_p4 = pnand %p1599_p13, %p1598_p7 }
  0xc4   : > { %p894_p12 = pneg %p893_p4 }
  0xc6   : > { %1105 = dma.done.wait (%p894_p12), %s636_s28, 128  }
  0xc7   : > { %1107 = vsyncadd (%p894_p12), %s636_s28, 4294967168  ;;  %s25_s20 = sadd.s32 1, %s1130_s20   ;;  %s1600_s26 = sld [smem:[#allocation18_spill]] }
  0xc8   : > { %p22_p5 = scmp.ge.s32.totalorder %s25_s20, 4   ;;  %s1601_s0 = sld [smem:[#allocation17_spill]] }
  0xc9   : > { %s1602_s15 = smov %s1114_s16  ;;  %s1603_s16 = smov %s1118_s17 }
  0xca   : > { %s1605_s18 = smov %s1126_s19  ;;  %24 = sbr.rel (!%p22_p5) target bundleno = 14 (0xe), region = 113 }
  0xcd   : > { %s1604_s17 = smov %s1600_s26 }
  0xce   : > { %s1606_s19 = smov %s1601_s0 }
  0xcf   :  { %641 = vsyncpa [#allocation3], 1 }
  0xd0   :  { %643 = vsyncpa [#allocation3 + $0x1], 1 }
  0xd1   :  { %644 = vsyncpa [#allocation10], 1 }
  0xd2   :  { %646 = vsyncpa [#allocation10 + $0x1], 1 }
  0xd3   :  { %647 = vsyncpa [#allocation4], 1 }
  0xd4   :  { %649 = vsyncpa [#allocation4 + $0x1], 1 }
  0xd5   :  { %650 = vsyncpa [#allocation5], 1 }
  0xd6   :  { %652 = vsyncpa [#allocation5 + $0x1], 1 }
  0xd7   :  { %653 = vsyncpa [#allocation6], 1 }
  0xd8   :  { %655 = vsyncpa [#allocation6 + $0x1], 1 }

</bundles_post_ra>
